<compile_context>
chip_gen: v7x
topology: tpu7x:2x2x1
jax: 0.10.0
libtpu: 0.0.40
codegen_flags: <defaults>
</compile_context>

<pallas_src>
import functools

import jax
import jax.numpy as jnp
from jax.experimental import pallas as pl
from jax.experimental.pallas import tpu as pltpu

_BN_EPS = 1e-5
_LANE = 128
_SUBLANE = 8


def _round_up(x, m):
    return ((x + m - 1) // m) * m


# -----------------------------------------------------------------------------
# Fused kernel: grid=(3,) over branches (G, H, W), one program per branch.
#   scalar prefetch : n_nodes (3,) i32, inv_n (3,) f32, alphas (3, L) f32
#   blocked inputs  : feat (N_pad, P) f32, adj (N_pad, N_pad) bf16,
#                     w (L, P, P) bf16, vec (L, 8, P) f32 [b/gamma/beta],
#                     pool (R_pad, N_pad) f32  (pool + global-row placement)
#   output          : (R_pad, P) f32 — this branch's rows, zeros elsewhere.
# -----------------------------------------------------------------------------
def _hybrid_kernel(n_ref, invn_ref, alpha_ref,
                   feat_ref, adj_ref, w_ref, vec_ref, pool_ref,
                   out_ref, *, nlayer, use_gmp):
    b = pl.program_id(0)

    n_pad = feat_ref.shape[0]
    n_real = n_ref[b]                                   # SMEM scalar (int32)
    inv_n = invn_ref[b]                                 # SMEM scalar (f32)

    # 1.0 for real node rows of this branch, 0.0 for padding rows.
    row_ids = jax.lax.broadcasted_iota(jnp.int32, (n_pad, 1), 0)
    row_mask = (row_ids < n_real).astype(jnp.float32)

    adj = adj_ref[...]                                  # (N_pad, N_pad) bf16
    pool = pool_ref[...]                                # (R_pad, N_pad) f32
    x = feat_ref[...]                                   # (N_pad, P)     f32

    if use_gmp:
        acc_out = jnp.zeros(out_ref.shape, jnp.float32)
        # rows with an empty pool group must contribute 0, not finfo.min
        has_any = jnp.sum(pool, axis=1, keepdims=True) > 0.5
        neg = jnp.finfo(jnp.float32).min
    else:
        acc_nodes = jnp.zeros(x.shape, jnp.float32)

    # Static unroll is fine for small nlayer; switch to lax.fori_loop carrying
    # (x, acc) if nlayer grows beyond ~4 to bound vreg live ranges.
    for i in range(nlayer):
        vec = vec_ref[i]                                # (8, P) f32
        bias, gamma, beta = vec[0:1], vec[1:2], vec[2:3]
        alpha = alpha_ref[b, i]                         # SMEM scalar (f32)

        # GCNConv: A_hat @ (X @ W) + b  — bf16 MXU operands, f32 accumulation.
        xw = jnp.dot(x.astype(jnp.bfloat16), w_ref[i],
                     preferred_element_type=jnp.float32)
        h = jnp.dot(adj, xw.astype(jnp.bfloat16),
                    preferred_element_type=jnp.float32) + bias
        t = jnp.tanh(h)

        # BatchNorm1d (training-mode, biased variance) over REAL nodes only,
        # single reduction pass; clamp var against fp cancellation.
        tm = t * row_mask
        mean = jnp.sum(tm, axis=0, keepdims=True) * inv_n
        mean2 = jnp.sum(tm * t, axis=0, keepdims=True) * inv_n
        var = jnp.maximum(mean2 - mean * mean, 0.0)
        y = gamma * (t - mean) * jax.lax.rsqrt(var + _BN_EPS) + beta

        if use_gmp:
            # Masked max over pool groups; loop over nodes so live data stays
            # 2-D (no (R, N, P) broadcast -> bounded VMEM, v7x-safe).
            mx = jnp.full(out_ref.shape, neg, jnp.float32)
            for n in range(n_pad):
                sel = pool[:, n:n + 1] > 0.5            # (R_pad, 1)
                mx = jnp.maximum(mx, jnp.where(sel, y[n:n + 1, :], neg))
            acc_out = acc_out + alpha * jnp.where(has_any, mx, 0.0)
        else:
            # Pooling is linear -> fold the layer mix at node granularity.
            acc_nodes = acc_nodes + alpha * y

        x = y                                           # stays resident in VMEM

    if use_gmp:
        out_ref[...] = acc_out
    else:
        out_ref[...] = jnp.dot(pool, acc_nodes,
                               preferred_element_type=jnp.float32)


# -----------------------------------------------------------------------------
# Jitted forward: softmax of layer-mix weights + ONE pallas_call + tiny epilogue
# -----------------------------------------------------------------------------
def hybrid_forward(mix_weights, packed, *, nlayer, rank, total_rows, use_GMP):
    alphas = jax.nn.softmax(mix_weights, axis=-1)       # exp(w) / sum(exp(w))

    n_branches, n_pad, p = packed["feat"].shape
    r_pad = packed["pool"].shape[1]

    kernel = functools.partial(_hybrid_kernel, nlayer=nlayer, use_gmp=use_GMP)
    out = pl.pallas_call(
        kernel,
        out_shape=jax.ShapeDtypeStruct((n_branches, r_pad, p), jnp.float32),
        grid_spec=pltpu.PrefetchScalarGridSpec(
            num_scalar_prefetch=3,
            grid=(n_branches,),
            in_specs=[
                pl.BlockSpec((None, n_pad, p), lambda b, *_: (b, 0, 0)),
                pl.BlockSpec((None, n_pad, n_pad), lambda b, *_: (b, 0, 0)),
                pl.BlockSpec((None, nlayer, p, p), lambda b, *_: (b, 0, 0, 0)),
                pl.BlockSpec((None, nlayer, _SUBLANE, p),
                             lambda b, *_: (b, 0, 0, 0)),
                pl.BlockSpec((None, r_pad, n_pad), lambda b, *_: (b, 0, 0)),
            ],
            out_specs=pl.BlockSpec((None, r_pad, p), lambda b, *_: (b, 0, 0)),
        ),
        compiler_params=pltpu.CompilerParams(
            dimension_semantics=("parallel",)),  # branch programs shard on v7x
    )(packed["n_nodes"], packed["inv_n"], alphas,
      packed["feat"], packed["adj"], packed["w"], packed["vec"], packed["pool"])

    # Each branch wrote only its own global rows (zeros elsewhere):
    # summing the branch axis places G/H/W; slice the real rank lanes out.
    return jnp.sum(out, axis=0)[:total_rows, :rank]


# -----------------------------------------------------------------------------
# One-time host preprocessing (hoisted out of the jitted per-call path)
# -----------------------------------------------------------------------------
def prepare_inputs(params, graphs, *, nlayer, rank, use_GMP):
    p = _round_up(rank, _LANE)

    feats = [graphs["G_feature"], graphs["H_feature"], graphs["W_feature"]]
    adjs = [graphs["adj_G"], graphs["adj_H"], graphs["adj_W"]]
    n_nodes = [int(f.shape[0]) for f in feats]
    n_pad = _round_up(max(n_nodes), _SUBLANE)

    n_graphs = int(graphs["pool_mat_G"].shape[0])
    row_counts = [n_graphs, n_nodes[1], n_nodes[2]]     # output rows per branch
    total_rows = sum(row_counts)
    r_pad = _round_up(total_rows, _SUBLANE)
    offsets = [0, row_counts[0], row_counts[0] + row_counts[1]]

    # features / adjacency padded to (N_pad, P) / (N_pad, N_pad)
    feat_all = jnp.stack([
        jnp.pad(f, ((0, n_pad - f.shape[0]), (0, p - f.shape[1])))
        for f in feats])
    adj_all = jnp.stack([
        jnp.pad(a, ((0, n_pad - a.shape[0]), (0, n_pad - a.shape[1])))
        for a in adjs]).astype(jnp.bfloat16)

    # per-branch layer parameters, packed & padded
    branches = [params["g"], params["h"], params["w"]]
    w_all = jnp.stack([
        jnp.stack([jnp.pad(w, ((0, p - w.shape[0]), (0, p - w.shape[1])))
                   for w in br["w"]]) for br in branches]).astype(jnp.bfloat16)

    def _vec_layer(br, i):
        m = jnp.zeros((_SUBLANE, p), jnp.float32)
        for r, v in enumerate([br["b"][i], br["gamma"][i], br["beta"][i]]):
            m = m.at[r, :v.shape[0]].set(v)
        return m

    vec_all = jnp.stack([
        jnp.stack([_vec_layer(br, i) for i in range(nlayer)])
        for br in branches])

    # pool / placement matrices mapping each branch into its GLOBAL output rows
    pool_G = graphs["pool_mask_G"] if use_GMP else graphs["pool_mat_G"]

    def place(mat, row_off):
        out = jnp.zeros((r_pad, n_pad), jnp.float32)
        return out.at[row_off:row_off + mat.shape[0], :mat.shape[1]].set(mat)

    pool_all = jnp.stack([
        place(pool_G, offsets[0]),
        place(jnp.eye(n_nodes[1], dtype=jnp.float32), offsets[1]),
        place(jnp.eye(n_nodes[2], dtype=jnp.float32), offsets[2]),
    ])

    packed = dict(
        feat=feat_all, adj=adj_all, w=w_all, vec=vec_all, pool=pool_all,
        n_nodes=jnp.asarray(n_nodes, jnp.int32),
        inv_n=1.0 / jnp.asarray(n_nodes, jnp.float32),
    )
    meta = dict(total_rows=total_rows)
    return packed, meta


# -----------------------------------------------------------------------------
# Graph / parameter construction helpers
# -----------------------------------------------------------------------------
def normalized_adjacency(edge_index, num_nodes, edge_weight=None):
    """Dense D^{-1/2}(A + I)D^{-1/2} (GCNConv normalization with self loops)."""
    src = jnp.asarray(edge_index[0], jnp.int32)
    dst = jnp.asarray(edge_index[1], jnp.int32)
    if edge_weight is None:
        edge_weight = jnp.ones(src.shape[0], jnp.float32)
    a = jnp.zeros((num_nodes, num_nodes), jnp.float32)
    a = a.at[dst, src].add(edge_weight)
    a = a + jnp.eye(num_nodes, dtype=jnp.float32)
    deg = jnp.sum(a, axis=1)
    dinv = jnp.where(deg > 0, jax.lax.rsqrt(deg), 0.0)
    return dinv[:, None] * a * dinv[None, :]


def ring_edges(num_nodes, num_graphs):
    per = num_nodes // num_graphs
    src, dst = [], []
    for g in range(num_graphs):
        off = g * per
        for i in range(per):
            a, b = off + i, off + (i + 1) % per
            src += [a, b]
            dst += [b, a]
    return jnp.asarray(src, jnp.int32), jnp.asarray(dst, jnp.int32)


def glorot_uniform(key, fan_in, fan_out):
    limit = (6.0 / (fan_in + fan_out)) ** 0.5
    return jax.random.uniform(key, (fan_in, fan_out), jnp.float32,
                              minval=-limit, maxval=limit)


def init_branch_params(key, dim_in, rank, nlayer):
    ws, bs, gammas, betas = [], [], [], []
    d = dim_in
    for _ in range(nlayer):
        key, sub = jax.random.split(key)
        ws.append(glorot_uniform(sub, d, rank))
        bs.append(jnp.zeros((rank,), jnp.float32))      # GCNConv bias init
        gammas.append(jnp.ones((rank,), jnp.float32))   # BN weight init
        betas.append(jnp.zeros((rank,), jnp.float32))   # BN bias init
        d = rank
    return dict(w=ws, b=bs, gamma=gammas, beta=betas)


# -----------------------------------------------------------------------------
# Pure-JAX reference with the SAME numerics the kernel uses
# (bf16 MXU operands, f32 accumulation / tanh / BatchNorm).
# -----------------------------------------------------------------------------
def reference_forward(params, graphs, *, nlayer, rank, use_GMP):
    def dot_bf16(a, c):
        return jnp.dot(a.astype(jnp.bfloat16), c.astype(jnp.bfloat16),
                       preferred_element_type=jnp.float32)

    def layer(adj, x, w, b_, gamma, beta):
        h = dot_bf16(adj, dot_bf16(x, w)) + b_[None, :]
        t = jnp.tanh(h)
        mean = jnp.mean(t, axis=0, keepdims=True)
        mean2 = jnp.mean(t * t, axis=0, keepdims=True)
        var = jnp.maximum(mean2 - mean * mean, 0.0)
        return (gamma[None, :] * (t - mean) * jax.lax.rsqrt(var + _BN_EPS)
                + beta[None, :])

    def mix(w):
        e = jnp.exp(w)
        return e / jnp.sum(e)

    def branch(p, adj, x, alphas, pool_mat=None, pool_mask=None):
        acc = 0.0
        for i in range(nlayer):
            x = layer(adj, x, p["w"][i], p["b"][i], p["gamma"][i], p["beta"][i])
            if pool_mat is not None:
                e = jnp.dot(pool_mat, x)
            elif pool_mask is not None:
                e = jnp.max(jnp.where(pool_mask[:, :, None] > 0.5, x[None],
                                      jnp.finfo(jnp.float32).min), axis=1)
            else:
                e = x
            acc = acc + alphas[i] * e
        return acc

    G = branch(params["g"], graphs["adj_G"], graphs["G_feature"],
               mix(params["G_weight"]),
               pool_mat=None if use_GMP else graphs["pool_mat_G"],
               pool_mask=graphs["pool_mask_G"] if use_GMP else None)
    H = branch(params["h"], graphs["adj_H"], graphs["H_feature"],
               mix(params["H_weight"]))
    W = branch(params["w"], graphs["adj_W"], graphs["W_feature"],
               mix(params["W_weight"]))
    return jnp.concatenate([G, H, W], axis=0)


# -----------------------------------------------------------------------------
# Main
# -----------------------------------------------------------------------------
if __name__ == "__main__":
    key = jax.random.PRNGKey(0)

    # "args": rank, nlayer, pooling mode, graph sizes
    rank = 32
    nlayer = 2
    use_GMP = False                 # global_mean_pool branch of the encoder
    n_G, n_graphs = 16, 2           # drug graph: 16 nodes, 2 graphs in batch
    n_H, n_W = 12, 10               # H / W graphs

    k = jax.random.split(key, 8)
    G_feature = jax.random.normal(k[0], (n_G, rank), jnp.float32)
    H_feature = jax.random.normal(k[1], (n_H, rank), jnp.float32)
    W_feature = jax.random.normal(k[2], (n_W, rank), jnp.float32)

    edge_G = ring_edges(n_G, n_graphs)
    edge_H = ring_edges(n_H, 1)
    edge_W = ring_edges(n_W, 1)
    w_H = jax.random.uniform(k[3], (edge_H[0].shape[0],), jnp.float32, 0.5, 1.5)
    w_W = jax.random.uniform(k[4], (edge_W[0].shape[0],), jnp.float32, 0.5, 1.5)

    batch_G = jnp.repeat(jnp.arange(n_graphs, dtype=jnp.int32), n_G // n_graphs)
    one_hot = (batch_G[None, :] == jnp.arange(n_graphs)[:, None]).astype(jnp.float32)
    pool_mat_G = one_hot / jnp.sum(one_hot, axis=1, keepdims=True)  # mean pool
    pool_mask_G = one_hot                                           # max pool

    graphs = dict(
        G_feature=G_feature, H_feature=H_feature, W_feature=W_feature,
        adj_G=normalized_adjacency(edge_G, n_G),
        adj_H=normalized_adjacency(edge_H, n_H, w_H),
        adj_W=normalized_adjacency(edge_W, n_W, w_W),
        pool_mat_G=pool_mat_G, pool_mask_G=pool_mask_G,
    )

    params = dict(
        g=init_branch_params(k[5], rank, rank, nlayer),
        h=init_branch_params(k[6], rank, rank, nlayer),
        w=init_branch_params(k[7], rank, rank, nlayer),
        G_weight=jnp.ones((nlayer,), jnp.float32),   # nn.Parameter(ones(N_fea))
        H_weight=jnp.ones((nlayer,), jnp.float32),
        W_weight=jnp.ones((nlayer,), jnp.float32),
    )

    # One-time hoisted preprocessing (padding / packing / adjacency placement).
    packed, meta = prepare_inputs(params, graphs, nlayer=nlayer, rank=rank,
                                  use_GMP=use_GMP)
    mix_w = jnp.stack([params["G_weight"], params["H_weight"],
                       params["W_weight"]])

    fwd = jax.jit(functools.partial(hybrid_forward, nlayer=nlayer, rank=rank,
                                    total_rows=meta["total_rows"],
                                    use_GMP=use_GMP))
    graph_embed = fwd(mix_w, packed)
    jax.block_until_ready(graph_embed)

    assert graph_embed.shape == (n_graphs + n_H + n_W, rank)
    assert bool(jnp.all(jnp.isfinite(graph_embed)))

    ref = reference_forward(params, graphs, nlayer=nlayer, rank=rank,
                            use_GMP=use_GMP)
    assert bool(jnp.allclose(graph_embed, ref, rtol=5e-3, atol=5e-3))

    print("KERNEL_OK")
</pallas_src>

<mosaic_0001>
module attributes {stable_mosaic.version = 11 : i64} {
  func.func @_hybrid_kernel(%arg0: i32, %arg1: memref<3xi32, #tpu.memory_space<smem>>, %arg2: memref<3xf32, #tpu.memory_space<smem>>, %arg3: memref<3x2xf32, #tpu.memory_space<smem>>, %arg4: memref<1x16x128xf32, #tpu.memory_space<vmem>>, %arg5: memref<1x16x16xbf16, #tpu.memory_space<vmem>>, %arg6: memref<1x2x128x128xbf16, #tpu.memory_space<vmem>>, %arg7: memref<1x2x8x128xf32, #tpu.memory_space<vmem>>, %arg8: memref<1x24x16xf32, #tpu.memory_space<vmem>>, %arg9: memref<1x24x128xf32, #tpu.memory_space<vmem>>) attributes {dimension_semantics = [#tpu.dimension_semantics<parallel>], iteration_bounds = array<i64: 3>, scalar_prefetch = 3 : i64, scratch_operands = 0 : i64, tpu.core_type = #tpu.core_type<tc>, window_params = [{transform_indices = @transform_0, window_bounds = array<i64: 1, 16, 128>}, {transform_indices = @transform_1, window_bounds = array<i64: 1, 16, 16>}, {transform_indices = @transform_2, window_bounds = array<i64: 1, 2, 128, 128>}, {transform_indices = @transform_3, window_bounds = array<i64: 1, 2, 8, 128>}, {transform_indices = @transform_4, window_bounds = array<i64: 1, 24, 16>}, {transform_indices = @transform_5, window_bounds = array<i64: 1, 24, 128>}]} {
    %0 = arith.index_cast %arg0 : i32 to index
    %1 = memref.load %arg1[%0] : memref<3xi32, #tpu.memory_space<smem>>
    %2 = arith.index_cast %arg0 : i32 to index
    %3 = memref.load %arg2[%2] : memref<3xf32, #tpu.memory_space<smem>>
    %4 = tpu.iota {dimensions = array<i32: 0>} : vector<16x1xi32>
    %5 = vector.broadcast %1 : i32 to vector<16x1xi32>
    %6 = arith.cmpi slt, %4, %5 : vector<16x1xi32>
    %7 = arith.extui %6 : vector<16x1xi1> to vector<16x1xi32>
    %8 = arith.sitofp %7 : vector<16x1xi32> to vector<16x1xf32>
    %c0 = arith.constant 0 : index
    %c0_0 = arith.constant 0 : index
    %c0_1 = arith.constant 0 : index
    %9 = vector.load %arg5[%c0, %c0_0, %c0_1] : memref<1x16x16xbf16, #tpu.memory_space<vmem>>, vector<1x16x16xbf16>
    %10 = vector.shape_cast %9 : vector<1x16x16xbf16> to vector<16x16xbf16>
    %c0_2 = arith.constant 0 : index
    %c0_3 = arith.constant 0 : index
    %c0_4 = arith.constant 0 : index
    %11 = vector.load %arg8[%c0_2, %c0_3, %c0_4] : memref<1x24x16xf32, #tpu.memory_space<vmem>>, vector<1x24x16xf32>
    %12 = vector.shape_cast %11 : vector<1x24x16xf32> to vector<24x16xf32>
    %c0_5 = arith.constant 0 : index
    %c0_6 = arith.constant 0 : index
    %c0_7 = arith.constant 0 : index
    %13 = vector.load %arg4[%c0_5, %c0_6, %c0_7] : memref<1x16x128xf32, #tpu.memory_space<vmem>>, vector<1x16x128xf32>
    %14 = vector.shape_cast %13 : vector<1x16x128xf32> to vector<16x128xf32>
    %cst = arith.constant 0.000000e+00 : f32
    %15 = vector.broadcast %cst : f32 to vector<16x128xf32>
    %c0_8 = arith.constant 0 : index
    %c0_9 = arith.constant 0 : index
    %c0_10 = arith.constant 0 : index
    %c0_11 = arith.constant 0 : index
    %16 = vector.load %arg7[%c0_8, %c0_9, %c0_10, %c0_11] : memref<1x2x8x128xf32, #tpu.memory_space<vmem>>, vector<1x1x8x128xf32>
    %17 = vector.shape_cast %16 : vector<1x1x8x128xf32> to vector<8x128xf32>
    %18 = vector.extract_strided_slice %17 {offsets = [0, 0], sizes = [1, 128], strides = [1, 1]} : vector<8x128xf32> to vector<1x128xf32>
    %19 = vector.extract_strided_slice %17 {offsets = [1, 0], sizes = [1, 128], strides = [1, 1]} : vector<8x128xf32> to vector<1x128xf32>
    %20 = vector.extract_strided_slice %17 {offsets = [2, 0], sizes = [1, 128], strides = [1, 1]} : vector<8x128xf32> to vector<1x128xf32>
    %21 = arith.index_cast %arg0 : i32 to index
    %c0_12 = arith.constant 0 : index
    %22 = memref.load %arg3[%21, %c0_12] : memref<3x2xf32, #tpu.memory_space<smem>>
    %23 = arith.truncf %14 : vector<16x128xf32> to vector<16x128xbf16>
    %c0_13 = arith.constant 0 : index
    %c0_14 = arith.constant 0 : index
    %c0_15 = arith.constant 0 : index
    %c0_16 = arith.constant 0 : index
    %24 = vector.load %arg6[%c0_13, %c0_14, %c0_15, %c0_16] : memref<1x2x128x128xbf16, #tpu.memory_space<vmem>>, vector<1x1x128x128xbf16>
    %25 = vector.shape_cast %24 : vector<1x1x128x128xbf16> to vector<128x128xbf16>
    %cst_17 = arith.constant dense<0.000000e+00> : vector<16x128xf32>
    %26 = tpu.matmul %23, %25, %cst_17 {dimension_numbers = #tpu.dot_dimension_numbers<[1], [0], [0], [1], [0, 0, 1, 1], [], []>} : vector<16x128xbf16>, vector<128x128xbf16>, vector<16x128xf32> -> vector<16x128xf32>
    %27 = arith.truncf %26 : vector<16x128xf32> to vector<16x128xbf16>
    %cst_18 = arith.constant dense<0.000000e+00> : vector<16x128xf32>
    %28 = tpu.matmul %10, %27, %cst_18 {dimension_numbers = #tpu.dot_dimension_numbers<[1], [0], [0], [1], [0, 0, 1, 1], [], []>} : vector<16x16xbf16>, vector<16x128xbf16>, vector<16x128xf32> -> vector<16x128xf32>
    %29 = vector.broadcast %18 : vector<1x128xf32> to vector<16x128xf32>
    %30 = arith.addf %28, %29 : vector<16x128xf32>
    %31 = math.tanh %30 : vector<16x128xf32>
    %32 = vector.broadcast %8 : vector<16x1xf32> to vector<16x128xf32>
    %33 = arith.mulf %31, %32 : vector<16x128xf32>
    %cst_19 = arith.constant dense<0.000000e+00> : vector<128xf32>
    %34 = vector.multi_reduction <add>, %33, %cst_19 [0] : vector<16x128xf32> to vector<128xf32>
    %35 = vector.shape_cast %34 : vector<128xf32> to vector<1x128xf32>
    %36 = vector.broadcast %3 : f32 to vector<1x128xf32>
    %37 = arith.mulf %35, %36 : vector<1x128xf32>
    %38 = arith.mulf %33, %31 : vector<16x128xf32>
    %cst_20 = arith.constant dense<0.000000e+00> : vector<128xf32>
    %39 = vector.multi_reduction <add>, %38, %cst_20 [0] : vector<16x128xf32> to vector<128xf32>
    %40 = vector.shape_cast %39 : vector<128xf32> to vector<1x128xf32>
    %41 = vector.broadcast %3 : f32 to vector<1x128xf32>
    %42 = arith.mulf %40, %41 : vector<1x128xf32>
    %43 = arith.mulf %37, %37 : vector<1x128xf32>
    %44 = arith.subf %42, %43 : vector<1x128xf32>
    %cst_21 = arith.constant 0.000000e+00 : f32
    %45 = vector.broadcast %cst_21 : f32 to vector<1x128xf32>
    %46 = arith.maximumf %44, %45 : vector<1x128xf32>
    %47 = vector.broadcast %37 : vector<1x128xf32> to vector<16x128xf32>
    %48 = arith.subf %31, %47 : vector<16x128xf32>
    %49 = vector.broadcast %19 : vector<1x128xf32> to vector<16x128xf32>
    %50 = arith.mulf %49, %48 : vector<16x128xf32>
    %cst_22 = arith.constant 9.99999974E-6 : f32
    %51 = vector.broadcast %cst_22 : f32 to vector<1x128xf32>
    %52 = arith.addf %46, %51 : vector<1x128xf32>
    %53 = math.rsqrt %52 : vector<1x128xf32>
    %54 = vector.broadcast %53 : vector<1x128xf32> to vector<16x128xf32>
    %55 = arith.mulf %50, %54 : vector<16x128xf32>
    %56 = vector.broadcast %20 : vector<1x128xf32> to vector<16x128xf32>
    %57 = arith.addf %55, %56 : vector<16x128xf32>
    %58 = vector.broadcast %22 : f32 to vector<16x128xf32>
    %59 = arith.mulf %58, %57 : vector<16x128xf32>
    %60 = arith.addf %15, %59 : vector<16x128xf32>
    %c0_23 = arith.constant 0 : index
    %c1 = arith.constant 1 : index
    %c0_24 = arith.constant 0 : index
    %c0_25 = arith.constant 0 : index
    %61 = vector.load %arg7[%c0_23, %c1, %c0_24, %c0_25] : memref<1x2x8x128xf32, #tpu.memory_space<vmem>>, vector<1x1x8x128xf32>
    %62 = vector.shape_cast %61 : vector<1x1x8x128xf32> to vector<8x128xf32>
    %63 = vector.extract_strided_slice %62 {offsets = [0, 0], sizes = [1, 128], strides = [1, 1]} : vector<8x128xf32> to vector<1x128xf32>
    %64 = vector.extract_strided_slice %62 {offsets = [1, 0], sizes = [1, 128], strides = [1, 1]} : vector<8x128xf32> to vector<1x128xf32>
    %65 = vector.extract_strided_slice %62 {offsets = [2, 0], sizes = [1, 128], strides = [1, 1]} : vector<8x128xf32> to vector<1x128xf32>
    %66 = arith.index_cast %arg0 : i32 to index
    %c1_26 = arith.constant 1 : index
    %67 = memref.load %arg3[%66, %c1_26] : memref<3x2xf32, #tpu.memory_space<smem>>
    %68 = arith.truncf %57 : vector<16x128xf32> to vector<16x128xbf16>
    %c0_27 = arith.constant 0 : index
    %c1_28 = arith.constant 1 : index
    %c0_29 = arith.constant 0 : index
    %c0_30 = arith.constant 0 : index
    %69 = vector.load %arg6[%c0_27, %c1_28, %c0_29, %c0_30] : memref<1x2x128x128xbf16, #tpu.memory_space<vmem>>, vector<1x1x128x128xbf16>
    %70 = vector.shape_cast %69 : vector<1x1x128x128xbf16> to vector<128x128xbf16>
    %cst_31 = arith.constant dense<0.000000e+00> : vector<16x128xf32>
    %71 = tpu.matmul %68, %70, %cst_31 {dimension_numbers = #tpu.dot_dimension_numbers<[1], [0], [0], [1], [0, 0, 1, 1], [], []>} : vector<16x128xbf16>, vector<128x128xbf16>, vector<16x128xf32> -> vector<16x128xf32>
    %72 = arith.truncf %71 : vector<16x128xf32> to vector<16x128xbf16>
    %cst_32 = arith.constant dense<0.000000e+00> : vector<16x128xf32>
    %73 = tpu.matmul %10, %72, %cst_32 {dimension_numbers = #tpu.dot_dimension_numbers<[1], [0], [0], [1], [0, 0, 1, 1], [], []>} : vector<16x16xbf16>, vector<16x128xbf16>, vector<16x128xf32> -> vector<16x128xf32>
    %74 = vector.broadcast %63 : vector<1x128xf32> to vector<16x128xf32>
    %75 = arith.addf %73, %74 : vector<16x128xf32>
    %76 = math.tanh %75 : vector<16x128xf32>
    %77 = vector.broadcast %8 : vector<16x1xf32> to vector<16x128xf32>
    %78 = arith.mulf %76, %77 : vector<16x128xf32>
    %cst_33 = arith.constant dense<0.000000e+00> : vector<128xf32>
    %79 = vector.multi_reduction <add>, %78, %cst_33 [0] : vector<16x128xf32> to vector<128xf32>
    %80 = vector.shape_cast %79 : vector<128xf32> to vector<1x128xf32>
    %81 = vector.broadcast %3 : f32 to vector<1x128xf32>
    %82 = arith.mulf %80, %81 : vector<1x128xf32>
    %83 = arith.mulf %78, %76 : vector<16x128xf32>
    %cst_34 = arith.constant dense<0.000000e+00> : vector<128xf32>
    %84 = vector.multi_reduction <add>, %83, %cst_34 [0] : vector<16x128xf32> to vector<128xf32>
    %85 = vector.shape_cast %84 : vector<128xf32> to vector<1x128xf32>
    %86 = vector.broadcast %3 : f32 to vector<1x128xf32>
    %87 = arith.mulf %85, %86 : vector<1x128xf32>
    %88 = arith.mulf %82, %82 : vector<1x128xf32>
    %89 = arith.subf %87, %88 : vector<1x128xf32>
    %cst_35 = arith.constant 0.000000e+00 : f32
    %90 = vector.broadcast %cst_35 : f32 to vector<1x128xf32>
    %91 = arith.maximumf %89, %90 : vector<1x128xf32>
    %92 = vector.broadcast %82 : vector<1x128xf32> to vector<16x128xf32>
    %93 = arith.subf %76, %92 : vector<16x128xf32>
    %94 = vector.broadcast %64 : vector<1x128xf32> to vector<16x128xf32>
    %95 = arith.mulf %94, %93 : vector<16x128xf32>
    %cst_36 = arith.constant 9.99999974E-6 : f32
    %96 = vector.broadcast %cst_36 : f32 to vector<1x128xf32>
    %97 = arith.addf %91, %96 : vector<1x128xf32>
    %98 = math.rsqrt %97 : vector<1x128xf32>
    %99 = vector.broadcast %98 : vector<1x128xf32> to vector<16x128xf32>
    %100 = arith.mulf %95, %99 : vector<16x128xf32>
    %101 = vector.broadcast %65 : vector<1x128xf32> to vector<16x128xf32>
    %102 = arith.addf %100, %101 : vector<16x128xf32>
    %103 = vector.broadcast %67 : f32 to vector<16x128xf32>
    %104 = arith.mulf %103, %102 : vector<16x128xf32>
    %105 = arith.addf %60, %104 : vector<16x128xf32>
    %cst_37 = arith.constant dense<0.000000e+00> : vector<24x128xf32>
    %106 = tpu.matmul %12, %105, %cst_37 {dimension_numbers = #tpu.dot_dimension_numbers<[1], [0], [0], [1], [0, 0, 1, 1], [], []>} : vector<24x16xf32>, vector<16x128xf32>, vector<24x128xf32> -> vector<24x128xf32>
    %c0_38 = arith.constant 0 : index
    %c0_39 = arith.constant 0 : index
    %c0_40 = arith.constant 0 : index
    %107 = vector.load %arg9[%c0_38, %c0_39, %c0_40] : memref<1x24x128xf32, #tpu.memory_space<vmem>>, vector<1x24x128xf32>
    %108 = vector.shape_cast %107 : vector<1x24x128xf32> to vector<24x128xf32>
    %109 = vector.shape_cast %106 : vector<24x128xf32> to vector<1x24x128xf32>
    tpu.vector_store %arg9[%c0_38, %c0_39, %c0_40], %109 {strides = array<i32>} : memref<1x24x128xf32, #tpu.memory_space<vmem>>, vector<1x24x128xf32>,
    return
  }
  func.func @transform_0(%arg0: i32, %arg1: memref<3xi32, #tpu.memory_space<smem>>, %arg2: memref<3xf32, #tpu.memory_space<smem>>, %arg3: memref<3x2xf32, #tpu.memory_space<smem>>) -> (i32, i32, i32) {
    %c0_i32 = arith.constant 0 : i32
    %c0_i32_0 = arith.constant 0 : i32
    %c0_i32_1 = arith.constant 0 : i32
    return %arg0, %c0_i32, %c0_i32_0 : i32, i32, i32
  }
  func.func @transform_1(%arg0: i32, %arg1: memref<3xi32, #tpu.memory_space<smem>>, %arg2: memref<3xf32, #tpu.memory_space<smem>>, %arg3: memref<3x2xf32, #tpu.memory_space<smem>>) -> (i32, i32, i32) {
    %c0_i32 = arith.constant 0 : i32
    %c0_i32_0 = arith.constant 0 : i32
    %c0_i32_1 = arith.constant 0 : i32
    return %arg0, %c0_i32, %c0_i32_0 : i32, i32, i32
  }
  func.func @transform_2(%arg0: i32, %arg1: memref<3xi32, #tpu.memory_space<smem>>, %arg2: memref<3xf32, #tpu.memory_space<smem>>, %arg3: memref<3x2xf32, #tpu.memory_space<smem>>) -> (i32, i32, i32, i32) {
    %c0_i32 = arith.constant 0 : i32
    %c0_i32_0 = arith.constant 0 : i32
    %c0_i32_1 = arith.constant 0 : i32
    %c0_i32_2 = arith.constant 0 : i32
    return %arg0, %c0_i32, %c0_i32_0, %c0_i32_1 : i32, i32, i32, i32
  }
  func.func @transform_3(%arg0: i32, %arg1: memref<3xi32, #tpu.memory_space<smem>>, %arg2: memref<3xf32, #tpu.memory_space<smem>>, %arg3: memref<3x2xf32, #tpu.memory_space<smem>>) -> (i32, i32, i32, i32) {
    %c0_i32 = arith.constant 0 : i32
    %c0_i32_0 = arith.constant 0 : i32
    %c0_i32_1 = arith.constant 0 : i32
    %c0_i32_2 = arith.constant 0 : i32
    return %arg0, %c0_i32, %c0_i32_0, %c0_i32_1 : i32, i32, i32, i32
  }
  func.func @transform_4(%arg0: i32, %arg1: memref<3xi32, #tpu.memory_space<smem>>, %arg2: memref<3xf32, #tpu.memory_space<smem>>, %arg3: memref<3x2xf32, #tpu.memory_space<smem>>) -> (i32, i32, i32) {
    %c0_i32 = arith.constant 0 : i32
    %c0_i32_0 = arith.constant 0 : i32
    %c0_i32_1 = arith.constant 0 : i32
    return %arg0, %c0_i32, %c0_i32_0 : i32, i32, i32
  }
  func.func @transform_5(%arg0: i32, %arg1: memref<3xi32, #tpu.memory_space<smem>>, %arg2: memref<3xf32, #tpu.memory_space<smem>>, %arg3: memref<3x2xf32, #tpu.memory_space<smem>>) -> (i32, i32, i32) {
    %c0_i32 = arith.constant 0 : i32
    %c0_i32_0 = arith.constant 0 : i32
    %c0_i32_1 = arith.constant 0 : i32
    return %arg0, %c0_i32, %c0_i32_0 : i32, i32, i32
  }
}

</mosaic_0001>

<bundles_post_ra>
// kernel: hybrid_forward.1
= control target key start
LH: loop header
LB: loop body
LE: loop exit
PB: predicated region body
PF: predicated region fallthrough
CT: control target
= control target key end

     0   :  { %s1630_s0 = inlined_call_operand.vmem [shape: s32[3], index: 0, kind: input, shape index: {}]   ;;  %s1631_s3 = inlined_call_operand.vmem [shape: f32[3,16,128], index: 3, kind: input, shape index: {}]   ;;  %s1632_s4 = inlined_call_operand.vmem [shape: bf16[3,16,16], index: 4, kind: input, shape index: {}]   ;;  %s1633_s5 = inlined_call_operand.hbm [shape: bf16[3,2,128,128], index: 5, kind: input, shape index: {}]   ;;  %s1634_s6 = inlined_call_operand.vmem [shape: f32[3,2,8,128], index: 6, kind: input, shape index: {}]   ;;  %s1635_s7 = inlined_call_operand.vmem [shape: f32[3,24,16], index: 7, kind: input, shape index: {}]   ;;  %s1636_s8 = inlined_call_operand.vmem [shape: f32[3,24,128], index: 8, kind: output, shape index: {}]   ;;  %s1637_s1 = inlined_call_operand.vmem [shape: f32[3], index: 1, kind: input, shape index: {}]   ;;  %s1638_s2 = inlined_call_operand.vmem [shape: f32[3,2], index: 2, kind: input, shape index: {}]  }
   0x1   :  { %s13_s29 = sshll.u32 %s1630_s0, 4  ;;  %s17_s10 = sshll.u32 %s1637_s1, 4  ;;  %s14_s29 = int_to_ptr.vmem [resolvable:$true] %s13_s29  ;;  %s18_s10 = int_to_ptr.vmem [resolvable:$true] %s17_s10 }
   0x2   :  { %s1225_s11 = scalar_lea.vmem %s14_s29, 16  ;;  %p1230_p1 = scmp.lt.s32.totalorder %s14_s29, %s14_s29 }
   0x3   :  { %p1226_p0 = scmp.ne.s32.totalorder %s14_s29, %s1225_s11  ;;  %p1231_p2 = scmp.lt.s32.totalorder %s1225_s11, %s1225_s11 }
   0x5   :  { %p1232_p3 = por %p1231_p2, %p1230_p1 }
   0x7   :  { %p1233_p4 = pnand %p1232_p3, %p1226_p0 }
   0x9   :  { %1236 = shalt.err (!%p1233_p4)  }
   0xa   :  { %s1329_s12 = smov [#allocation3]   ;;  %s1237_s13 = scalar_lea.vmem %s18_s10, 16 }
   0xb   :  { %16 = dma.vmem_to_smem %s14_s29, 16, %s1329_s12, [#allocation2] }
   0xc   :  { %p1238_p5 = scmp.ne.s32.totalorder %s18_s10, %s1237_s13  ;;  %p1242_p6 = scmp.lt.s32.totalorder %s18_s10, %s18_s10 }
   0xd   :  { %p1243_p7 = scmp.lt.s32.totalorder %s1237_s13, %s1237_s13 }
   0xf   :  { %p1244_p8 = por %p1243_p7, %p1242_p6 }
  0x11   :  { %p1245_p9 = pnand %p1244_p8, %p1238_p5 }
  0x13   :  { %1248 = shalt.err (!%p1245_p9)  }
  0x14   :  { %s1330_s0 = smov [#allocation4]   ;;  %s21_s15 = sshll.u32 %s1638_s2, 4  ;;  %s22_s15 = int_to_ptr.vmem [resolvable:$true] %s21_s15 }
  0x15   :  { %20 = dma.vmem_to_smem %s18_s10, 16, %s1330_s0, [#allocation2] }
  0x16   :  { %s1249_s16 = scalar_lea.vmem %s22_s15, 64  ;;  %p1254_p11 = scmp.lt.s32.totalorder %s22_s15, %s22_s15 }
  0x17   :  { %p1250_p10 = scmp.ne.s32.totalorder %s22_s15, %s1249_s16  ;;  %p1255_p12 = scmp.lt.s32.totalorder %s1249_s16, %s1249_s16 }
  0x19   :  { %p1256_p13 = por %p1255_p12, %p1254_p11 }
  0x1b   :  { %p1257_p0 = pnand %p1256_p13, %p1250_p10 }
  0x1d   :  { %1260 = shalt.err (!%p1257_p0)  }
  0x1e   :  { %s1331_s17 = smov [#allocation5]  }
  0x1f   :  { %24 = dma.vmem_to_smem %s22_s15, 64, %s1331_s17, [#allocation2] }
  0x20   :  { %1307 = dma.done.wait [#allocation2], 96 }
  0x21   :  { %1308 = vsyncadd [#allocation2], 4294967200 }
  0x22   :  { %26 = sfence }
  0x23   :  { %27 = vsyncpa [#allocation7], 0 }
  0x24   :  { %29 = vsyncpa [#allocation7 + $0x1], 0  ;;  %s1392_s18 = smov 0   ;;  %s1394_s19 = smov 0  }
  0x25   :  { %s1396_s2 = smov 0   ;;  %s1398_s20 = smov 0  }
  0x26 LB: > { %s1411_s21 = sadd.s32 4294967295, %s1327_s20   ;;  %s1414_s22 = sadd.s32 1, %s1327_s20   ;;  %s1327_s20 = sphi %s1398_s20, %s1645_s20   ;;  %s1323_s2 = sphi %s1396_s2, %s1644_s2   ;;  %s1319_s19 = sphi %s1394_s19, %s1643_s19   ;;  %s1315_s18 = sphi %s1392_s18, %s1642_s18  }
  0x27   : > { %s91_s23 = ssub.s32 %s1327_s20, %s1414_s22  ;;  %s94_s24 = sadd.s32 1, %s1323_s2 }
  0x28   : > { %p92_p1 = scmp.eq.s32.totalorder %s91_s23, 0  ;;  %p101_p2 = scmp.ne.s32.totalorder %s1323_s2, %s1319_s19 }
  0x29   : > { %p102_p3 = scmp.eq.s32.totalorder %s1327_s20, 0  ;;  %p107_p4 = scmp.ne.s32.totalorder %s1319_s19, %s1315_s18 }
  0x2a   : > { %s1424_s25 = scalar_select %p92_p1, %s1323_s2, %s94_s24  }
  0x2b   : > { %p103_p5 = por %p102_p3, %p101_p2  ;;  %p108_p6 = scmp.eq.s32.totalorder %s1411_s21, 0 }
  0x2c   : > { %p1155_p7 = scmp.lt.s32.totalorder %s1327_s20, 3  ;;  %s225_s27 = sand.u32 1, %s1323_s2  }
  0x2d   : > { %p1428_p8 = por %p108_p6, %p107_p4  ;;  %s990_s28 = sshll.u32 %s225_s27, 7 }
  0x2e   : > { %s1047_s29 = sshll.u32 %s1327_s20, 11  ;;  %s229_s11 = scalar_lea.vmem [#allocation6], %s990_s28 }
  0x2f   : > { %s1437_s10 = scalar_lea.hbm %s1633_s5, %s1047_s29  ;;  %s236_s12 = sshll.u32 %s229_s11, 4  ;;  %s1439_s12 = int_to_ptr.vmem [resolvable:$true] %s236_s12 }
  0x30   : > { %p1441_p9 = pnand %p1155_p7, %p103_p5  ;;  %s1446_s0 = scalar_lea.sflag [#allocation7], %s225_s27 }
  0x31   : > { %s1261_s1 = scalar_lea.hbm %s1437_s10, 2048  ;;  %s1266_s16 = scalar_lea.hbm %s1633_s5, 6144 }
  0x32   : > { %p1262_p11 = scmp.ne.s32.totalorder %s1437_s10, %s1261_s1  ;;  %p1263_p12 = pneg %p1441_p9 }
  0x33   : > { %p1267_p1 = scmp.lt.u32.totalorder %s1437_s10, %s1633_s5  ;;  %p1268_p2 = scmp.lt.u32.totalorder %s1266_s16, %s1261_s1 }
  0x34   : > { %p1264_p13 = pnand %p1263_p12, %p1262_p11  ;;  %p1270_p4 = scmp.lt.u32.totalorder %s1261_s1, %s1437_s10 }
  0x35   : > { %p1269_p3 = por %p1268_p2, %p1267_p1 }
  0x36   : > { %p1265_p0 = pneg %p1264_p13 }
  0x37   : > { %p1271_p5 = por %p1270_p4, %p1269_p3 }
  0x39   : > { %p1272_p6 = pnand %p1271_p5, %p1265_p0 }
  0x3b   : > { %1275 = shalt.err (!%p1272_p6)
}
  0x3c   : > { %s1276_s23 = scalar_lea.vmem %s1439_s12, 2048  ;;  %s1332_s24 = smov [#allocation6]  }
  0x3d   : > { %p1277_p7 = scmp.ne.s32.totalorder %s1439_s12, %s1276_s23  ;;  %s1281_s27 = sshll.u32 %s1332_s24, 4  ;;  %s1282_s27 = int_to_ptr.vmem [resolvable:$false] %s1281_s27 }
  0x3e   : > { %s1283_s28 = scalar_lea.vmem %s1282_s27, 4096  ;;  %p1284_p10 = scmp.lt.s32.totalorder %s1439_s12, %s1282_s27 }
  0x3f   : > { %p1279_p11 = pnand %p1277_p7, %p1263_p12  ;;  %p1285_p1 = scmp.lt.s32.totalorder %s1283_s28, %s1276_s23 }
  0x41   : > { %p1280_p13 = pneg %p1279_p11  ;;  %p1286_p2 = por %p1285_p1, %p1284_p10 }
  0x43   : > { %p1287_p3 = pnand %p1286_p2, %p1280_p13 }
  0x45   : > { %1290 = shalt.err (!%p1287_p3)
}
  0x46   : > { %s1333_s29 = smov 64   ;;  %s1334_s30 = smov 4  }
  0x47   : > { %1154 = dma.hbm_to_vmem [thread:$0]  (!%p1441_p9), %s1437_s10, 2048, %s1439_s12, %s1446_s0, %s1333_s29, %s1333_s29, %s1334_s30  }
  0x48   : > { %p260_p12 = scmp.lt.s32.totalorder %s1327_s20, 4  ;;  %p1641_p0 = scmp.ge.s32.totalorder %s1327_s20, 1 }
  0x4a   : > { %p261_p4 = pnand %p1641_p0, %p260_p12 }
  0x4b   : > { %s266_s9 = sand.u32 (!%p261_p4), 1, %s1319_s19  }
  0x4c   : > { %264 = sbr.rel (%p261_p4) target bundleno = 1320 (0x528), region = 40  ;;  %s994_s11 = sshll.u32 (!%p261_p4), %s266_s9, 7 }
  0x4d   : > { %s267_s1 = scalar_lea.sflag (!%p261_p4), [#allocation7], %s266_s9  ;;  %s1478_s14 = scalar_lea.vmem (!%p261_p4), [#allocation6], %s994_s11 }
  0x53   : > { %1310 = dma.done.wait (%p1428_p8), %s267_s1, 2048  }
  0x54   : > { %1312 = vsyncadd (%p1428_p8), %s267_s1, 4294965248  ;;  %v1335_v0 = vmov 0.0   ;;  %vm1336_vm0 = vmmov 0   ;;  %v1196_v1 = vld [vmem:[%s1478_s14] sm:$0xff]   ;;  %v1197_v2 = vld [vmem:[%s1478_s14 + $0x8] sm:$0xff]   ;;  %p317_p8 = scmp.lt.s32.totalorder %s1411_s21, 2  ;;  %v345_v26 = vlaneseq }
  0x55   : > { %1078 = vmatprep.subr.bf16.mxu0 %v1335_v0  ;;  %1094 = vmatprep.mubr.msk.bf16.mxu0 %vm1336_vm0, %v1335_v0  ;;  %v1198_v3 = vld [vmem:[%s1478_s14 + $0x10] sm:$0xff]   ;;  %v1199_v4 = vld [vmem:[%s1478_s14 + $0x18] sm:$0xff]   ;;  %v1200_v5 = vld [vmem:[%s1478_s14 + $0x20] sm:$0xff]   ;;  %vm481_vm1 = vcmask 130048   ;;  %s343_s27 = sld [smem:[#allocation3 + %s1411_s21]]  ;;  %s1005_s29 = sshll.u32 %s1411_s21, 7 }
  0x56   : > { %1098 = vmatprep.subr.bf16.mxu1 %v1335_v0  ;;  %1100 = vmatprep.mubr.msk.bf16.mxu1 %vm1336_vm0, %v1335_v0  ;;  %s1501_s20 = scalar_select %p317_p8, %s1411_s21, 2  ;;  %v1201_v6 = vld [vmem:[%s1478_s14 + $0x28] sm:$0xff]   ;;  %v1202_v7 = vld [vmem:[%s1478_s14 + $0x30] sm:$0xff]   ;;  %v1203_v8 = vld [vmem:[%s1478_s14 + $0x38] sm:$0xff]   ;;  %v1544_v27 = vshrl.u32 %v345_v26, 7 }
  0x57   : > { %1079 = vmatpush3.bf16.msra.mxu0 %v1196_v1  ;;  %v1205_v18 = vld [vmem:[%s1478_s14 + $0x40] sm:$0xff]   ;;  %v1206_v19 = vld [vmem:[%s1478_s14 + $0x48] sm:$0xff]   ;;  %v1207_v20 = vld [vmem:[%s1478_s14 + $0x50] sm:$0xff]   ;;  %s344_s28 = sld [smem:[#allocation4 + %s1411_s21]]  ;;  %s577_s30 = sadd.s32 1, %s1005_s29 }
  0x58   : > { %1080 = vmatprep.subr.bf16.mxu0 %v1335_v0  ;;  %s1048_s26 = sshll.u32 %s1501_s20, 4  ;;  %s1049_s0 = sshll.u32 %s1501_s20, 3  ;;  %v1208_v21 = vld [vmem:[%s1478_s14 + $0x58] sm:$0xff]   ;;  %v1209_v22 = vld [vmem:[%s1478_s14 + $0x60] sm:$0xff]   ;;  %v1210_v23 = vld [vmem:[%s1478_s14 + $0x68] sm:$0xff]   ;;  %v474_v28 = vsub.s32 0, %v1544_v27 }
  0x59   : > { %s321_s13 = scalar_lea.vmem %s1631_s3, %s1048_s26  ;;  %s326_s17 = scalar_lea.vmem %s1632_s4, %s1049_s0  ;;  %v1211_v24 = vld [vmem:[%s1478_s14 + $0x70] sm:$0xff]   ;;  %v1212_v25 = vld [vmem:[%s1478_s14 + $0x78] sm:$0xff]   ;;  %v347_v38 = vadd.s32 8, %v1544_v27 }
  0x5a   : > { %v360_v9 = vld [vmem:[%s321_s13] sm:$0xff]  ;;  %v361_v10 = vld [vmem:[%s321_s13 + $0x8] sm:$0xff]  ;;  %s1551_s24 = scalar_lea.vmem %s1634_s6, %s1048_s26  ;;  %s364_s9 = sld [smem:[#allocation5 + %s1005_s29]] }
  0x5b   : > { %1081 = vmatpush3.bf16.msra.mxu0 %v1197_v2  ;;  %v365_v11 = vpack.c.bf16 %v361_v10, %v360_v9  ;;  %v1522_v17 = vld [vmem:[%s326_s17] sm:$0xff]   ;;  %v348_v37 = vstv %s343_s27  ;;  %v566_v9 = vsub.s32 2, %v1544_v27  ;;  %v1016_v26 = vld [vmem:[%s1551_s24 + $0x8] sm:$0xff]  ;;  %s578_s11 = sld [smem:[#allocation5 + %s577_s30]]  ;;  %s1148_s21 = smul.u32 24, %s1501_s20 }
  0x5c   : > { %1082 = vmatprep.subr.bf16.mxu0 %v1335_v0  ;;  %v362_v29 = vld [vmem:[%s1551_s24] sm:$0xff]  ;;  %vm349_vm2 = vcmp.lt.s32.totalorder %v1544_v27, %v348_v37  ;;  %vm350_vm3 = vcmp.lt.s32.totalorder %v347_v38, %v348_v37 }
  0x5d   : > { %v475_v30 = vrot.slane %v362_v29, %v474_v28  ;;  %v1561_v39 = vsel %vm349_vm2, 1.0, %v1335_v0  ;;  %v1564_v41 = vsel %vm350_vm3, 1.0, %v1335_v0  ;;  %v1569_v58 = vstv %s344_s28  ;;  %s336_s26 = scalar_lea.vmem %s1635_s7, %s1148_s21  ;;  %s341_s12 = scalar_lea.vmem %s1636_s8, %s1148_s21 }
  0x5e   : > { %v567_v10 = vrot.slane %v362_v29, %v566_v9 }
  0x5f   : > { %1083 = vmatpush3.bf16.msra.mxu0 %v1198_v3 }
  0x60   : > { %1084 = vmatprep.subr.bf16.mxu0 %v1335_v0 }
  0x63   : > { %1085 = vmatpush3.bf16.msra.mxu0 %v1199_v4 }
  0x64   : > { %1086 = vmatprep.subr.bf16.mxu0 %v1335_v0 }
  0x67   : > { %1087 = vmatpush3.bf16.msra.mxu0 %v1200_v5 }
  0x68   : > { %1088 = vmatprep.subr.bf16.mxu0 %v1335_v0 }
  0x6b   : > { %1089 = vmatpush3.bf16.msra.mxu0 %v1201_v6 }
  0x6c   : > { %1090 = vmatprep.subr.bf16.mxu0 %v1335_v0 }
  0x6f   : > { %1091 = vmatpush3.bf16.msra.mxu0 %v1202_v7  ;;  %v556_v7 = vsub.s32 1, %v1544_v27 }
  0x70   : > { %1092 = vmatprep.subr.bf16.mxu0 %v1335_v0 }
  0x73   : > { %1093 = vmatpush3.bf16.msra.mxu0 %v1203_v8  ;;  %v557_v8 = vrot.slane %v362_v29, %v556_v7  ;;  %v690_v29 = vrot.slane %v1016_v26, %v474_v28 }
  0x74   : > { %1124 = vmatprep.subr.bf16.mxu0 %v1335_v0 }
  0x76   : > { %1095 = vmatmul.mubr.bf16.vlgmr.msra.gmra.mrb[0].mxu0 %v365_v11 }
  0x77   : > { %1126 = vmatprep.mubr.msk.bf16.mxu0 %vm1336_vm0, %v1335_v0 }
 0x149   : > { %v464_v12 = vpop.f32.mrb[0].mxu0 }
 0x14a   : > { %v1096_v13 = vpop.f32.mrb[1].mxu0 }
 0x14b   : > { %v467_v14 = vpop.f32.mrb[2].mxu0 }
 0x14c   : > { %v471_v15 = vpack.c.bf16 %v467_v14, %v464_v12  ;;  %v1097_v16 = vpop.f32.mrb[3].mxu0 }
 0x14e   : > { %1099 = vmatpush3.bf16.msra.mxu1 %v471_v15 }
 0x14f   : > { %1104 = vmatprep.subr.bf16.mxu1 %v1335_v0 }
 0x151   : > { %1101 = vmatmul.mubr.msk.bf16.vlgmr.msra.gmra.mrb[0].mxu1 %vm481_vm1, %v1522_v17 }
 0x152   : > { %1120 = vmatprep.mubr.msk.bf16.mxu1 %vm1336_vm0, %v1335_v0  ;;  %1105 = vmatpush3.bf16.msra.mxu1 %v1205_v18 }
 0x153   : > { %1106 = vmatprep.subr.bf16.mxu1 %v1335_v0 }
 0x156   : > { %1107 = vmatpush3.bf16.msra.mxu1 %v1206_v19 }
 0x157   : > { %1108 = vmatprep.subr.bf16.mxu1 %v1335_v0 }
 0x15a   : > { %1109 = vmatpush3.bf16.msra.mxu1 %v1207_v20 }
 0x15b   : > { %1110 = vmatprep.subr.bf16.mxu1 %v1335_v0 }
 0x15e   : > { %1111 = vmatpush3.bf16.msra.mxu1 %v1208_v21 }
 0x15f   : > { %1112 = vmatprep.subr.bf16.mxu1 %v1335_v0 }
 0x162   : > { %1113 = vmatpush3.bf16.msra.mxu1 %v1209_v22 }
 0x163   : > { %1114 = vmatprep.subr.bf16.mxu1 %v1335_v0 }
 0x166   : > { %1115 = vmatpush3.bf16.msra.mxu1 %v1210_v23 }
 0x167   : > { %1116 = vmatprep.subr.bf16.mxu1 %v1335_v0 }
 0x16a   : > { %1117 = vmatpush3.bf16.msra.mxu1 %v1211_v24 }
 0x16b   : > { %1118 = vmatprep.subr.bf16.mxu1 %v1335_v0 }
 0x16e   : > { %1119 = vmatpush3.bf16.msra.mxu1 %v1212_v25  ;;  %v1337_v25 = vmov 0.0|0.0  }
 0x16f   : > { %1146 = vmatprep.subr.bf16.mxu1 %v1337_v25 }
 0x224   : > { %v519_v31 = vpop.f32.mrb[0].mxu1 }
 0x225   : > { %v520_v32 = vadd.f32 %v519_v31, %v475_v30  ;;  %v1102_v33 = vpop.f32.mrb[1].mxu1 }
 0x226   : > { %v522_v34 = vpop.f32.mrb[2].mxu1 }
 0x227   : > { %1213 = vtanh.f32 %v520_v32  ;;  %v523_v35 = vadd.f32 %v522_v34, %v475_v30  ;;  %v1103_v36 = vpop.f32.mrb[3].mxu1 }
 0x229   : > { %1215 = vtanh.f32 %v523_v35 }
 0x231   : > { %v1214_v40 = vpop.eup %1213 }
 0x232   : > { %v528_v42 = vmul.f32 %v1214_v40, %v1561_v39 }
 0x233   : > { %v1216_v43 = vpop.eup %1215 }
 0x234   : > { %v529_v44 = vmul.f32 %v1216_v43, %v1564_v41  ;;  %v539_v45 = vmul.f32 %v1214_v40, %v528_v42 }
 0x236   : > { %v530_v46 = vadd.f32 %v529_v44, %v528_v42  ;;  %v540_v47 = vmul.f32 %v1216_v43, %v529_v44 }
 0x238   : > { %v541_v48 = vadd.f32 %v540_v47, %v539_v45  ;;  %v531_v49 = vrot.slane %v530_v46, 4 }
 0x23a   : > { %v542_v50 = vrot.slane %v541_v48, 4  ;;  %v532_v51 = vadd.f32 %v531_v49, %v530_v46 }
 0x23c   : > { %v543_v52 = vadd.f32 %v542_v50, %v541_v48  ;;  %v533_v53 = vrot.slane %v532_v51, 2 }
 0x23e   : > { %v544_v54 = vrot.slane %v543_v52, 2  ;;  %v534_v55 = vadd.f32 %v533_v53, %v532_v51 }
 0x240   : > { %v535_v56 = vrot.slane %v534_v55, 1  ;;  %v545_v57 = vadd.f32 %v544_v54, %v543_v52 }
 0x242   : > { %v536_v59 = vadd.f32 %v535_v56, %v534_v55  ;;  %v546_v60 = vrot.slane %v545_v57, 1 }
 0x244   : > { %v538_v61 = vmul.f32 %v1569_v58, %v536_v59  ;;  %v547_v62 = vadd.f32 %v546_v60, %v545_v57 }
 0x246   : > { %v548_v63 = vmul.f32 %v547_v62, %v1569_v58  ;;  %v549_v1 = vmul.f32 %v538_v61, %v538_v61  ;;  %v552_v2 = vsub.f32 %v1214_v40, %v538_v61  ;;  %v553_v3 = vsub.f32 %v1216_v43, %v538_v61 }
 0x248   : > { %v550_v4 = vsub.f32 %v548_v63, %v549_v1  ;;  %v558_v11 = vmul.f32 %v557_v8, %v552_v2  ;;  %v559_v12 = vmul.f32 %v557_v8, %v553_v3  ;;  %v762_v63 = vrot.slane %v1016_v26, %v556_v7 }
 0x249   : > { %v772_v1 = vrot.slane %v1016_v26, %v566_v9  ;;  %v775_v8 = vstv %s578_s11  ;;  %v358_v9 = vld [vmem:[%s336_s26 + $0x8] sm:$0xff] }
 0x24a   : > { %v551_v5 = vmax.f32 %v550_v4, 0.0 }
 0x24c   : > { %v560_v6 = vadd.f32 1e-05, %v551_v5 }
 0x24e   : > { %1217 = vrsqrt.f32 %v560_v6  ;;  %v570_v6 = vstv %s364_s9 }
 0x258   : > { %v1218_v13 = vpop.eup %1217 }
 0x259   : > { %v562_v14 = vmul.f32 %v1218_v13, %v558_v11  ;;  %v563_v15 = vmul.f32 %v1218_v13, %v559_v12 }
 0x25b   : > { %v1579_v16 = vadd.f32 %v567_v10, %v562_v14  ;;  %v1581_v18 = vadd.f32 %v567_v10, %v563_v15 }
 0x25d   : > { %v579_v19 = vpack.c.bf16 %v1581_v18, %v1579_v16  ;;  %v571_v12 = vmul.f32 %v570_v6, %v1579_v16  ;;  %v572_v13 = vmul.f32 %v570_v6, %v1581_v18  ;;  %v359_v16 = vld [vmem:[%s336_s26 + $0x10] sm:$0xff] }
 0x25f   : > { %1121 = vmatmul.mubr.bf16.vlgmr.msra.gmra.mrb[4].mxu1 %v579_v19 }
 0x260   : > { %1137 = vmatprep.mubr.msk.f32.mxu1 %vm1336_vm0, %v1335_v0 }
 0x332   : > { %v679_v20 = vpop.f32.mrb[4].mxu1 }
 0x333   : > { %v1122_v21 = vpop.f32.mrb[5].mxu1 }
 0x334   : > { %v682_v22 = vpop.f32.mrb[6].mxu1 }
 0x335   : > { %v686_v23 = vpack.c.bf16 %v682_v22, %v679_v20  ;;  %v1123_v24 = vpop.f32.mrb[7].mxu1  ;;  %v357_v20 = vld [vmem:[%s336_s26] sm:$0xff] }
 0x337   : > { %1125 = vmatpush3.bf16.msra.mxu0 %v686_v23 }
 0x338   : > { %1143 = vmatprep.subr.bf16.mxu0 %v1337_v25 }
 0x33a   : > { %1127 = vmatmul.mubr.msk.bf16.vlgmr.msra.gmra.mrb[4].mxu0 %vm481_vm1, %v1522_v17 }
 0x33b   : > { %1134 = vmatprep.mubr.msk.f32.mxu0 %vm1336_vm0, %v1335_v0 }
 0x40d   : > { %v725_v30 = vpop.f32.mrb[4].mxu0 }
 0x40e   : > { %v726_v31 = vadd.f32 %v725_v30, %v690_v29  ;;  %v1128_v32 = vpop.f32.mrb[5].mxu0 }
 0x40f   : > { %v728_v33 = vpop.f32.mrb[6].mxu0 }
 0x410   : > { %1219 = vtanh.f32 %v726_v31  ;;  %v729_v34 = vadd.f32 %v728_v33, %v690_v29  ;;  %v1129_v35 = vpop.f32.mrb[7].mxu0 }
 0x412   : > { %1221 = vtanh.f32 %v729_v34 }
 0x41a   : > { %v1220_v36 = vpop.eup %1219 }
 0x41b   : > { %v734_v17 = vmul.f32 %v1220_v36, %v1561_v39 }
 0x41c   : > { %v1222_v37 = vpop.eup %1221 }
 0x41d   : > { %v735_v38 = vmul.f32 %v1222_v37, %v1564_v41  ;;  %v744_v40 = vmul.f32 %v1220_v36, %v734_v17 }
 0x41f   : > { %v736_v42 = vadd.f32 %v735_v38, %v734_v17  ;;  %v745_v43 = vmul.f32 %v1222_v37, %v735_v38 }
 0x421   : > { %v737_v44 = vrot.slane %v736_v42, 4  ;;  %v746_v45 = vadd.f32 %v745_v43, %v744_v40 }
 0x423   : > { %v738_v28 = vadd.f32 %v737_v44, %v736_v42  ;;  %v747_v46 = vrot.slane %v746_v45, 4 }
 0x425   : > { %v748_v47 = vadd.f32 %v747_v46, %v746_v45  ;;  %v739_v48 = vrot.slane %v738_v28, 2 }
 0x427   : > { %v749_v49 = vrot.slane %v748_v47, 2  ;;  %v740_v50 = vadd.f32 %v739_v48, %v738_v28 }
 0x429   : > { %v750_v51 = vadd.f32 %v749_v49, %v748_v47  ;;  %v741_v52 = vrot.slane %v740_v50, 1 }
 0x42b   : > { %v751_v53 = vrot.slane %v750_v51, 1  ;;  %v742_v54 = vadd.f32 %v741_v52, %v740_v50 }
 0x42d   : > { %v743_v39 = vmul.f32 %v742_v54, %v1569_v58  ;;  %v752_v55 = vadd.f32 %v751_v53, %v750_v51 }
 0x42f   : > { %v753_v41 = vmul.f32 %v752_v55, %v1569_v58  ;;  %v754_v56 = vmul.f32 %v743_v39, %v743_v39  ;;  %v757_v57 = vsub.f32 %v1220_v36, %v743_v39  ;;  %v758_v59 = vsub.f32 %v1222_v37, %v743_v39 }
 0x431   : > { %v755_v60 = vsub.f32 %v753_v41, %v754_v56  ;;  %v763_v2 = vmul.f32 %v762_v63, %v757_v57  ;;  %v764_v58 = vmul.f32 %v762_v63, %v758_v59 }
 0x433   : > { %v756_v61 = vmax.f32 %v755_v60, 0.0 }
 0x435   : > { %v765_v62 = vadd.f32 1e-05, %v756_v61 }
 0x437   : > { %1223 = vrsqrt.f32 %v765_v62 }
 0x441   : > { %v1224_v3 = vpop.eup %1223 }
 0x442   : > { %v767_v4 = vmul.f32 %v1224_v3, %v763_v2  ;;  %v768_v5 = vmul.f32 %v1224_v3, %v764_v58 }
 0x444   : > { %v773_v10 = vadd.f32 %v772_v1, %v767_v4  ;;  %v774_v11 = vadd.f32 %v772_v1, %v768_v5 }
 0x446   : > { %v776_v14 = vmul.f32 %v775_v8, %v773_v10  ;;  %v777_v15 = vmul.f32 %v775_v8, %v774_v11 }
 0x448   : > { %v778_v7 = vadd.f32 %v776_v14, %v571_v12  ;;  %v779_v19 = vadd.f32 %v777_v15, %v572_v13 }
 0x44a   : > { %v1144_v27 = vpack.c.bf16 %v779_v19, %v778_v7 }
 0x44c   : > { %1145 = vmatpush3.bf16.msra.mxu0 %v1144_v27  ;;  %1147 = vmatpush3.bf16.msra.mxu1 %v1144_v27 }
 0x44f   : > { %1138 = vmatmul.mubr.msk.f32.vlgmr.msra.gmra.mrb[8].mxu1 %vm481_vm1, %v358_v9  ;;  %1135 = vmatmul.mubr.msk.f32.vlgmr.msra.gmra.mrb[8].mxu0 %vm481_vm1, %v357_v20 }
 0x450   : > { %1140 = vmatprep.mubr.msk.f32.mxu1 %vm1336_vm0, %v1335_v0 }
 0x453   : > { %1141 = vmatmul.mubr.msk.f32.gmra.mrb[10].mxu1 %vm481_vm1, %v359_v16 }
 0x522   : > { %v860_v18 = vpop.f32.mrb[8].mxu1  ;;  %v855_v21 = vpop.f32.mrb[8].mxu0 }
 0x523   : > { %870 = vst [vmem:[%s341_s12 + $0x8] sm:$0xff] %v860_v18  ;;  %v1139_v22 = vpop.f32.mrb[9].mxu1  ;;  %869 = vst [vmem:[%s341_s12] sm:$0xff] %v855_v21  ;;  %v1136_v23 = vpop.f32.mrb[9].mxu0 }
 0x526   : > { %v865_v24 = vpop.f32.mrb[10].mxu1 }
 0x527   : > { %871 = vst [vmem:[%s341_s12 + $0x10] sm:$0xff] %v865_v24  ;;  %v1142_v25 = vpop.f32.mrb[11].mxu1 }
 0x528 PF: > { %p32_p9 = scmp.ge.s32.totalorder %s1414_s22, 5   ;;  %s1642_s18 = smov %s1319_s19 }
 0x529   : > { %s1643_s19 = smov %s1323_s2  ;;  %s1644_s2 = smov %s1424_s25 }
 0x52a   : > { %s1645_s20 = smov %s1414_s22  ;;  %34 = sbr.rel (!%p32_p9) target bundleno = 38 (0x26), region = 94 }
 0x531   :  { %893 = vsyncpa [#allocation7], 1 }
 0x532   :  { %895 = vsyncpa [#allocation7 + $0x1], 1 }

</bundles_post_ra>
